<compile_context>
chip_gen: v5e
topology: v5e:2x2
jax: 0.10.0
libtpu: 0.0.40
codegen_flags: <defaults>
</compile_context>

<pallas_src>
import functools

import jax
import jax.numpy as jnp
import numpy as np
from jax import lax
from jax.experimental import pallas as pl
from jax.experimental.pallas import tpu as pltpu


def _silu_f32(v):
    # v * sigmoid(v), kept in f32 (VPU/EUP path; v5e has no bf16 VALU/EUP).
    return v * (1.0 / (1.0 + jnp.exp(-v)))


# --------------------------- Pallas kernels ---------------------------------

def _gn_stats_kernel(x_ref, mask_cg_ref, mask_gc_ref, gamma_ref, beta_ref,
                     a_ref, b_ref, *, eps, inv_cnt):
    """GroupNorm stats prepass (one grid step per sample).

    Emits per-(n, c) affine a, b so that gn_silu(x) == silu(x * a + b);
    the affine+SiLU is applied inside the conv kernels (fusion).
    Two-pass variance (subtract mean, then square) + clamp for stability.
    """
    x = x_ref[0].astype(jnp.float32)                            # (H, W, C)
    s = jnp.sum(jnp.sum(x, axis=0), axis=0, keepdims=True)      # (1, C)
    mask_cg = mask_cg_ref[...]                                  # (C, G) f32
    mask_gc = mask_gc_ref[...]                                  # (G, C) f32
    mean_g = jnp.dot(s, mask_cg, preferred_element_type=jnp.float32) * inv_cnt
    mean_c = jnp.dot(mean_g, mask_gc, preferred_element_type=jnp.float32)
    d = x - mean_c
    sq = jnp.sum(jnp.sum(d * d, axis=0), axis=0, keepdims=True)  # (1, C)
    var_g = jnp.dot(sq, mask_cg, preferred_element_type=jnp.float32) * inv_cnt
    var_g = jnp.maximum(var_g, 0.0)
    inv_c = jnp.dot(lax.rsqrt(var_g + eps), mask_gc,
                    preferred_element_type=jnp.float32)          # (1, C)
    a = inv_c * gamma_ref[...].astype(jnp.float32)
    b = beta_ref[...].astype(jnp.float32) - mean_c * a
    a_ref[0] = a.astype(a_ref.dtype)
    b_ref[0] = b.astype(b_ref.dtype)


def _conv3x3_kernel(*refs, th, w_sp, cin, cout, has_norm, has_add, has_res,
                    has_shortcut, scale):
    """3x3 conv on one (n, H-tile) block.

    Builds a zero-padded (th+2, W+2, Cin) slab in VMEM (halo rows come from
    1-row halo blocks, masked with pl.when at the image border), optionally
    applies the fused GroupNorm affine + SiLU while filling the slab, then does
    a single im2col bf16 matmul with K = 9*Cin.  Epilogue fuses bias, per-(n,c)
    add (time embedding), identity residual, 1x1-conv shortcut and scaling.
    """
    it = iter(refs)
    x_ref, xtop_ref, xbot_ref = next(it), next(it), next(it)
    if has_norm:
        a_ref, b_ref = next(it), next(it)
    w_ref, bias_ref = next(it), next(it)
    add_ref = next(it) if has_add else None
    res_ref = next(it) if has_res else None
    if has_shortcut:
        xs_ref, scw_ref, scb_ref = next(it), next(it), next(it)
    o_ref = next(it)
    slab_ref = next(it)

    h_idx = pl.program_id(1)
    n_h = pl.num_programs(1)

    if has_norm:
        ga = a_ref[0].astype(jnp.float32)        # (1, Cin)
        gb = b_ref[0].astype(jnp.float32)

        def tform(v):
            return _silu_f32(v * ga + gb)
    else:
        def tform(v):
            return v

    # ---- zero-padded input slab in VMEM (no wrapper-side jnp.pad) ----
    slab_ref[...] = jnp.zeros(slab_ref.shape, slab_ref.dtype)
    slab_ref[1:th + 1, 1:w_sp + 1, :] = tform(x_ref[0].astype(jnp.float32))

    @pl.when(h_idx > 0)
    def _():
        slab_ref[0:1, 1:w_sp + 1, :] = tform(xtop_ref[0].astype(jnp.float32))

    @pl.when(h_idx < n_h - 1)
    def _():
        slab_ref[th + 1:th + 2, 1:w_sp + 1, :] = tform(
            xbot_ref[0].astype(jnp.float32))

    # ---- im2col: one (th*W, 9*Cin) bf16 matrix -> single MXU matmul ----
    taps = []
    for ky in range(3):
        for kx in range(3):
            t = slab_ref[ky:ky + th, kx:kx + w_sp, :]            # (th, W, Cin) f32
            taps.append(t.reshape(th * w_sp, cin).astype(jnp.bfloat16))
    cols = jnp.concatenate(taps, axis=-1)                        # (th*W, 9*Cin)
    acc = jnp.dot(cols, w_ref[...], preferred_element_type=jnp.float32)
    acc = acc + bias_ref[...].astype(jnp.float32)                # (1, Cout) bcast
    if has_add:
        acc = acc + add_ref[0].astype(jnp.float32)               # time embedding
    if has_res:
        acc = acc + res_ref[0].astype(jnp.float32).reshape(th * w_sp, cout)
    if has_shortcut:
        xs = xs_ref[0].reshape(th * w_sp, xs_ref.shape[-1]).astype(jnp.bfloat16)
        acc = acc + jnp.dot(xs, scw_ref[...], preferred_element_type=jnp.float32)
        acc = acc + scb_ref[...].astype(jnp.float32)
    if scale != 1.0:
        acc = acc * scale
    o_ref[0] = acc.reshape(th, w_sp, cout).astype(o_ref.dtype)


def _upconv3x3_kernel(x_ref, xtop_ref, xbot_ref, w_ref, bias_ref, o_ref,
                      slab_ref, *, th, w_sp, cin, cout):
    """Fused nearest-2x upsample + 3x3 conv on one (n, H-tile) block.

    Decomposed into 4 output phases (py, px); each phase is a 2x2-tap conv over
    the UN-upsampled source slab with phase-summed weights, so the 4x upsampled
    activation is never materialized.  The two px phases are concatenated along
    the lane axis (2*Cout lanes, lane-dense store); py phases are interleaved
    along rows; the wrapper un-interleaves px with a free reshape.
    """
    h_idx = pl.program_id(1)
    n_h = pl.num_programs(1)

    slab_ref[...] = jnp.zeros(slab_ref.shape, slab_ref.dtype)
    slab_ref[1:th + 1, 1:w_sp + 1, :] = x_ref[0].astype(jnp.float32)

    @pl.when(h_idx > 0)
    def _():
        slab_ref[0:1, 1:w_sp + 1, :] = xtop_ref[0].astype(jnp.float32)

    @pl.when(h_idx < n_h - 1)
    def _():
        slab_ref[th + 1:th + 2, 1:w_sp + 1, :] = xbot_ref[0].astype(jnp.float32)

    bias = bias_ref[...].astype(jnp.float32)                     # (1, Cout)
    py_rows = []
    for py in range(2):
        px_cols = []
        for px in range(2):
            taps = []
            for dy in range(2):
                for dx in range(2):
                    t = slab_ref[py + dy:py + dy + th, px + dx:px + dx + w_sp, :]
                    taps.append(t.reshape(th * w_sp, cin).astype(jnp.bfloat16))
            cols = jnp.concatenate(taps, axis=-1)                # (th*W, 4*Cin)
            acc = jnp.dot(cols, w_ref[py * 2 + px],
                          preferred_element_type=jnp.float32) + bias
            px_cols.append(acc.reshape(th, w_sp, cout))
        py_rows.append(jnp.concatenate(px_cols, axis=-1))        # (th, W, 2*Cout)
    out = jnp.stack(py_rows, axis=1)                             # (th, 2, W, 2*Cout)
    o_ref[0] = out.reshape(2 * th, w_sp, 2 * cout).astype(o_ref.dtype)


def _silu_linear_kernel(t_ref, w_ref, b_ref, o_ref):
    """Time-embedding projection: out = silu(temb) @ W + b (tiny, single shot)."""
    t = _silu_f32(t_ref[...].astype(jnp.float32))
    out = jnp.dot(t.astype(jnp.bfloat16), w_ref[...],
                  preferred_element_type=jnp.float32)
    o_ref[...] = (out + b_ref[...].astype(jnp.float32)).astype(o_ref.dtype)


# --------------------------- thin wrappers -----------------------------------

def _pick_block_rows(h):
    # Largest of {16, 8, 4, 2, 1} dividing H while keeping >= 2 grid steps so the
    # DMA of tile i+1 overlaps compute of tile i; for real shapes bump the cap
    # per-generation (v6e can afford much larger tiles than v7x's 64 MiB VMEM).
    for cand in (16, 8, 4, 2, 1):
        if cand < h and h % cand == 0:
            return cand
    return h


def gn_stats(x, gamma, beta, groups, eps):
    """Per-sample GroupNorm stats -> per-(n,c) affine (a, b), each (N, 1, C)."""
    n, hh, ww, c = x.shape
    cpg = c // groups
    ch = np.arange(c)
    mask_cg = jnp.asarray((ch[:, None] // cpg) == np.arange(groups)[None, :],
                          dtype=jnp.float32)                       # (C, G)
    mask_gc = jnp.transpose(mask_cg)                               # (G, C)
    kern = functools.partial(_gn_stats_kernel, eps=float(eps),
                             inv_cnt=1.0 / float(hh * ww * cpg))
    # TODO(synk): for very large H*W this per-sample stats pass should itself be
    # H-tiled (partial-sum reduction); fine at mobile-diffusion spatial sizes.
    a, b = pl.pallas_call(
        kern,
        grid=(n,),
        in_specs=[
            pl.BlockSpec((1, hh, ww, c), lambda i: (i, 0, 0, 0)),
            pl.BlockSpec((c, groups), lambda i: (0, 0)),
            pl.BlockSpec((groups, c), lambda i: (0, 0)),
            pl.BlockSpec((1, c), lambda i: (0, 0)),
            pl.BlockSpec((1, c), lambda i: (0, 0)),
        ],
        out_specs=(pl.BlockSpec((1, 1, c), lambda i: (i, 0, 0)),
                   pl.BlockSpec((1, 1, c), lambda i: (i, 0, 0))),
        out_shape=(jax.ShapeDtypeStruct((n, 1, c), jnp.float32),
                   jax.ShapeDtypeStruct((n, 1, c), jnp.float32)),
        compiler_params=pltpu.CompilerParams(
            dimension_semantics=("parallel",)),
    )(x, mask_cg, mask_gc, gamma.reshape(1, c), beta.reshape(1, c))
    return a, b


def conv3x3_fused(x, w_im2col, bias, *, norm_ab=None, add=None, residual=None,
                  shortcut=None, scale=1.0, block_rows=None):
    """3x3 conv over NHWC x, gridded over (N, H-tiles) with 1-row halo blocks.

    W should be a multiple of 8 so the in-kernel (th, W, C) <-> (th*W, C)
    reshapes are layout-preserving.
    """
    n, hh, ww, cin = x.shape
    cout = w_im2col.shape[-1]
    th = _pick_block_rows(hh) if block_rows is None else block_rows
    grid = (n, hh // th)

    inputs = [x, x, x]                      # main tile + top halo + bottom halo
    in_specs = [
        pl.BlockSpec((1, th, ww, cin), lambda i, j: (i, j, 0, 0)),
        pl.BlockSpec((1, 1, ww, cin),
                     lambda i, j: (i, jnp.maximum(j * th - 1, 0), 0, 0)),
        pl.BlockSpec((1, 1, ww, cin),
                     lambda i, j: (i, jnp.minimum((j + 1) * th, hh - 1), 0, 0)),
    ]
    if norm_ab is not None:
        inputs += list(norm_ab)
        in_specs += [pl.BlockSpec((1, 1, cin), lambda i, j: (i, 0, 0))] * 2
    inputs += [w_im2col, bias.reshape(1, cout)]
    in_specs += [pl.BlockSpec((9 * cin, cout), lambda i, j: (0, 0)),
                 pl.BlockSpec((1, cout), lambda i, j: (0, 0))]
    if add is not None:
        inputs.append(add)
        in_specs.append(pl.BlockSpec((1, 1, cout), lambda i, j: (i, 0, 0)))
    if residual is not None:
        inputs.append(residual)
        in_specs.append(pl.BlockSpec((1, th, ww, cout), lambda i, j: (i, j, 0, 0)))
    if shortcut is not None:
        xs, scw, scb = shortcut
        ccat = xs.shape[-1]
        inputs += [xs, scw, scb.reshape(1, cout)]
        in_specs += [
            pl.BlockSpec((1, th, ww, ccat), lambda i, j: (i, j, 0, 0)),
            pl.BlockSpec((ccat, cout), lambda i, j: (0, 0)),
            pl.BlockSpec((1, cout), lambda i, j: (0, 0)),
        ]

    kern = functools.partial(
        _conv3x3_kernel, th=th, w_sp=ww, cin=cin, cout=cout,
        has_norm=norm_ab is not None, has_add=add is not None,
        has_res=residual is not None, has_shortcut=shortcut is not None,
        scale=float(scale))
    return pl.pallas_call(
        kern,
        grid=grid,
        in_specs=in_specs,
        out_specs=pl.BlockSpec((1, th, ww, cout), lambda i, j: (i, j, 0, 0)),
        out_shape=jax.ShapeDtypeStruct((n, hh, ww, cout), x.dtype),
        scratch_shapes=[pltpu.VMEM((th + 2, ww + 2, cin), jnp.float32)],
        compiler_params=pltpu.CompilerParams(
            dimension_semantics=("parallel", "parallel")),
    )(*inputs)


def upconv2x_fused(x, w_phases, bias, *, block_rows=None):
    """Nearest-2x upsample + 3x3 conv, fused; x is the un-upsampled NHWC input."""
    n, hh, ww, cin = x.shape
    cout = w_phases.shape[-1]
    th = _pick_block_rows(hh) if block_rows is None else block_rows
    grid = (n, hh // th)
    kern = functools.partial(_upconv3x3_kernel, th=th, w_sp=ww, cin=cin, cout=cout)
    out = pl.pallas_call(
        kern,
        grid=grid,
        in_specs=[
            pl.BlockSpec((1, th, ww, cin), lambda i, j: (i, j, 0, 0)),
            pl.BlockSpec((1, 1, ww, cin),
                         lambda i, j: (i, jnp.maximum(j * th - 1, 0), 0, 0)),
            pl.BlockSpec((1, 1, ww, cin),
                         lambda i, j: (i, jnp.minimum((j + 1) * th, hh - 1), 0, 0)),
            pl.BlockSpec((4, 4 * cin, cout), lambda i, j: (0, 0, 0)),
            pl.BlockSpec((1, cout), lambda i, j: (0, 0)),
        ],
        out_specs=pl.BlockSpec((1, 2 * th, ww, 2 * cout),
                               lambda i, j: (i, j, 0, 0)),
        out_shape=jax.ShapeDtypeStruct((n, 2 * hh, ww, 2 * cout), x.dtype),
        scratch_shapes=[pltpu.VMEM((th + 2, ww + 2, cin), jnp.float32)],
        compiler_params=pltpu.CompilerParams(
            dimension_semantics=("parallel", "parallel")),
    )(x, x, x, w_phases, bias.reshape(1, cout))
    # memory order is (n, 2i+py, j, px, c) -> free reshape to (N, 2H, 2W, Cout)
    return out.reshape(n, 2 * hh, 2 * ww, cout)


def silu_linear(t, w_bf16, b):
    n = t.shape[0]
    cout = w_bf16.shape[-1]
    vspec = pl.BlockSpec(memory_space=pltpu.MemorySpace.VMEM)
    return pl.pallas_call(
        _silu_linear_kernel,
        out_shape=jax.ShapeDtypeStruct((n, cout), t.dtype),
        in_specs=[vspec, vspec, vspec],
        out_specs=vspec,
    )(t, w_bf16, b.reshape(1, cout))


# --------------------------- parameter layout --------------------------------

def _conv_w_im2col(w_oihw):
    # PyTorch OIHW (Cout, Cin, 3, 3) -> (9*Cin, Cout) bf16, row = (ky*3+kx)*Cin + cin
    cout, cin = w_oihw.shape[0], w_oihw.shape[1]
    return (jnp.transpose(w_oihw, (2, 3, 1, 0))
            .reshape(9 * cin, cout).astype(jnp.bfloat16))


def _upsample_phase_weights(w_oihw):
    # 3x3 conv on a nearest-2x upsampled input == 4 phase-specific 2x2 convs on
    # the source; phase p = py*2+px, taps ordered (dy, dx) row-major.
    w = jnp.transpose(w_oihw, (2, 3, 1, 0))                      # (3, 3, Cin, Cout)
    k_sets = (((0,), (1, 2)), ((0, 1), (2,)))                    # [phase][d] -> taps
    phases = []
    for py in range(2):
        for px in range(2):
            taps = []
            for dy in range(2):
                for dx in range(2):
                    acc = 0.0
                    for ky in k_sets[py][dy]:
                        for kx in k_sets[px][dx]:
                            acc = acc + w[ky, kx]                # (Cin, Cout)
                    taps.append(acc)
            phases.append(jnp.concatenate(taps, axis=0))         # (4*Cin, Cout)
    return jnp.stack(phases, axis=0).astype(jnp.bfloat16)        # (4, 4*Cin, Cout)


# --------------------------- module forward ----------------------------------

def up_block_2d_mobile_forward(hidden_nchw, res_nchw, temb, params, *,
                               groups, eps=1e-6, output_scale_factor=1.0,
                               add_upsample=True):
    """Matches UpBlock2DMobile.forward (eval mode, num_layers=1, scale=1.0)."""
    n = hidden_nchw.shape[0]
    # skip concat on the channel (lane) axis after one NHWC transpose
    x = jnp.concatenate([jnp.transpose(hidden_nchw, (0, 2, 3, 1)),
                         jnp.transpose(res_nchw, (0, 2, 3, 1))], axis=-1)
    _, hh, ww, cin = x.shape
    cout = params["conv1_b"].shape[0]

    # ---- ResnetBlock2D ----
    a1, b1 = gn_stats(x, params["gn1_g"], params["gn1_b"], groups, eps)
    temb_proj = silu_linear(
        temb, jnp.transpose(params["temb_w"]).astype(jnp.bfloat16),
        params["temb_b"]).reshape(n, 1, cout)
    h1 = conv3x3_fused(x, _conv_w_im2col(params["conv1_w"]), params["conv1_b"],
                       norm_ab=(a1, b1), add=temb_proj)

    a2, b2 = gn_stats(h1, params["gn2_g"], params["gn2_b"], groups, eps)
    # TODO(synk): dropout omitted (eval mode / p=0.0 -> identity).
    inv_scale = 1.0 / output_scale_factor
    if cin != cout:
        shortcut = (x,
                    jnp.transpose(params["sc_w"][:, :, 0, 0]).astype(jnp.bfloat16),
                    params["sc_b"])
        h2 = conv3x3_fused(h1, _conv_w_im2col(params["conv2_w"]),
                           params["conv2_b"], norm_ab=(a2, b2),
                           shortcut=shortcut, scale=inv_scale)
    else:
        h2 = conv3x3_fused(h1, _conv_w_im2col(params["conv2_w"]),
                           params["conv2_b"], norm_ab=(a2, b2),
                           residual=x, scale=inv_scale)

    # ---- Upsample2D (nearest 2x + 3x3 conv, fused) ----
    if add_upsample:
        out = upconv2x_fused(h2, _upsample_phase_weights(params["up_w"]),
                             params["up_b"])
    else:
        out = h2
    return jnp.transpose(out, (0, 3, 1, 2))                      # back to NCHW


# --------------------------- pure-JAX reference -------------------------------

def _ref_forward(hidden, res, temb, p, *, groups, eps=1e-6):
    x = jnp.concatenate([hidden, res], axis=1)

    def gn(v, g, b):
        n, c, hh, ww = v.shape
        vg = v.reshape(n, groups, c // groups, hh, ww)
        m = jnp.mean(vg, axis=(2, 3, 4), keepdims=True)
        var = jnp.mean((vg - m) ** 2, axis=(2, 3, 4), keepdims=True)
        vn = ((vg - m) / jnp.sqrt(var + eps)).reshape(n, c, hh, ww)
        return vn * g[None, :, None, None] + b[None, :, None, None]

    def conv(v, w, b, pad):
        out = lax.conv_general_dilated(v, w, (1, 1), [(pad, pad), (pad, pad)],
                                       dimension_numbers=("NCHW", "OIHW", "NCHW"))
        return out + b[None, :, None, None]

    def silu(v):
        return v * (1.0 / (1.0 + jnp.exp(-v)))

    h = conv(silu(gn(x, p["gn1_g"], p["gn1_b"])), p["conv1_w"], p["conv1_b"], 1)
    t = silu(temb) @ p["temb_w"].T + p["temb_b"]
    h = h + t[:, :, None, None]
    h = conv(silu(gn(h, p["gn2_g"], p["gn2_b"])), p["conv2_w"], p["conv2_b"], 1)
    sc = conv(x, p["sc_w"], p["sc_b"], 0) if x.shape[1] != h.shape[1] else x
    h = sc + h
    h = jnp.repeat(jnp.repeat(h, 2, axis=2), 2, axis=3)
    h = conv(h, p["up_w"], p["up_b"], 1)
    return h


# --------------------------- params & main ------------------------------------

def init_params(key, in_ch, out_ch, temb_ch):
    ks = jax.random.split(key, 14)

    def nrm(k, shape, s=0.05):
        return jax.random.normal(k, shape, jnp.float32) * s

    return {
        "gn1_g": 1.0 + nrm(ks[0], (in_ch,), 0.1),
        "gn1_b": nrm(ks[1], (in_ch,), 0.1),
        "conv1_w": nrm(ks[2], (out_ch, in_ch, 3, 3)),
        "conv1_b": nrm(ks[3], (out_ch,)),
        "temb_w": nrm(ks[4], (out_ch, temb_ch)),
        "temb_b": nrm(ks[5], (out_ch,)),
        "gn2_g": 1.0 + nrm(ks[6], (out_ch,), 0.1),
        "gn2_b": nrm(ks[7], (out_ch,), 0.1),
        "conv2_w": nrm(ks[8], (out_ch, out_ch, 3, 3)),
        "conv2_b": nrm(ks[9], (out_ch,)),
        "sc_w": nrm(ks[10], (out_ch, in_ch, 1, 1)),
        "sc_b": nrm(ks[11], (out_ch,)),
        "up_w": nrm(ks[12], (out_ch, out_ch, 3, 3)),
        "up_b": nrm(ks[13], (out_ch,)),
    }


if __name__ == "__main__":
    # Small config: hidden C=16 + skip C=16 -> in_channels=32, out_channels=64,
    # temb_channels=32, resnet_groups=8, num_layers=1, add_upsample=True.
    N, C_HID, C_RES, H, W = 2, 16, 16, 8, 8
    IN_CH, OUT_CH, TEMB_CH, GROUPS = C_HID + C_RES, 64, 32, 8

    key = jax.random.PRNGKey(0)
    k_h, k_r, k_t, k_p = jax.random.split(key, 4)
    hidden = jax.random.normal(k_h, (N, C_HID, H, W), jnp.float32)
    res_hidden = jax.random.normal(k_r, (N, C_RES, H, W), jnp.float32)
    temb = jax.random.normal(k_t, (N, TEMB_CH), jnp.float32)
    params = init_params(k_p, IN_CH, OUT_CH, TEMB_CH)

    out = up_block_2d_mobile_forward(hidden, res_hidden, temb, params,
                                     groups=GROUPS)
    out = jax.block_until_ready(out)
    assert out.shape == (N, OUT_CH, 2 * H, 2 * W), out.shape

    ref = jax.block_until_ready(
        _ref_forward(hidden, res_hidden, temb, params, groups=GROUPS))
    # Tolerance accounts for bf16 MXU operands (f32 accumulation) vs f32 reference.
    np.testing.assert_allclose(np.asarray(out), np.asarray(ref),
                               rtol=5e-2, atol=5e-2)
    print("KERNEL_OK")
</pallas_src>

<mosaic_0001>
module attributes {stable_mosaic.version = 11 : i64} {
  func.func @_gn_stats_kernel(%arg0: i32, %arg1: memref<1x8x8x32xf32, #tpu.memory_space<vmem>>, %arg2: memref<32x8xf32, #tpu.memory_space<vmem>>, %arg3: memref<8x32xf32, #tpu.memory_space<vmem>>, %arg4: memref<1x32xf32, #tpu.memory_space<vmem>>, %arg5: memref<1x32xf32, #tpu.memory_space<vmem>>, %arg6: memref<1x1x32xf32, #tpu.memory_space<vmem>>, %arg7: memref<1x1x32xf32, #tpu.memory_space<vmem>>) attributes {dimension_semantics = [#tpu.dimension_semantics<parallel>], iteration_bounds = array<i64: 2>, scalar_prefetch = 0 : i64, scratch_operands = 0 : i64, tpu.core_type = #tpu.core_type<tc>, window_params = [{transform_indices = @transform_0, window_bounds = array<i64: 1, 8, 8, 32>}, {pipeline_mode = #tpu.pipeline_mode<synchronous>, transform_indices = @transform_1, window_bounds = array<i64: 32, 8>}, {pipeline_mode = #tpu.pipeline_mode<synchronous>, transform_indices = @transform_2, window_bounds = array<i64: 8, 32>}, {pipeline_mode = #tpu.pipeline_mode<synchronous>, transform_indices = @transform_3, window_bounds = array<i64: 1, 32>}, {pipeline_mode = #tpu.pipeline_mode<synchronous>, transform_indices = @transform_4, window_bounds = array<i64: 1, 32>}, {transform_indices = @transform_5, window_bounds = array<i64: 1, 1, 32>}, {transform_indices = @transform_6, window_bounds = array<i64: 1, 1, 32>}]} {
    %c0 = arith.constant 0 : index
    %c0_0 = arith.constant 0 : index
    %c0_1 = arith.constant 0 : index
    %c0_2 = arith.constant 0 : index
    %0 = vector.load %arg1[%c0, %c0_0, %c0_1, %c0_2] : memref<1x8x8x32xf32, #tpu.memory_space<vmem>>, vector<1x8x8x32xf32>
    %1 = vector.shape_cast %0 : vector<1x8x8x32xf32> to vector<8x8x32xf32>
    %cst = arith.constant dense<0.000000e+00> : vector<8x32xf32>
    %2 = vector.multi_reduction <add>, %1, %cst [0] : vector<8x8x32xf32> to vector<8x32xf32>
    %cst_3 = arith.constant dense<0.000000e+00> : vector<32xf32>
    %3 = vector.multi_reduction <add>, %2, %cst_3 [0] : vector<8x32xf32> to vector<32xf32>
    %4 = vector.shape_cast %3 : vector<32xf32> to vector<1x32xf32>
    %c0_4 = arith.constant 0 : index
    %c0_5 = arith.constant 0 : index
    %5 = vector.load %arg2[%c0_4, %c0_5] : memref<32x8xf32, #tpu.memory_space<vmem>>, vector<32x8xf32>
    %c0_6 = arith.constant 0 : index
    %c0_7 = arith.constant 0 : index
    %6 = vector.load %arg3[%c0_6, %c0_7] : memref<8x32xf32, #tpu.memory_space<vmem>>, vector<8x32xf32>
    %cst_8 = arith.constant dense<0.000000e+00> : vector<1x8xf32>
    %7 = tpu.matmul %4, %5, %cst_8 {dimension_numbers = #tpu.dot_dimension_numbers<[1], [0], [0], [1], [0, 0, 1, 1], [], []>} : vector<1x32xf32>, vector<32x8xf32>, vector<1x8xf32> -> vector<1x8xf32>
    %cst_9 = arith.constant 3.906250e-03 : f32
    %8 = vector.broadcast %cst_9 : f32 to vector<1x8xf32>
    %9 = arith.mulf %7, %8 : vector<1x8xf32>
    %cst_10 = arith.constant dense<0.000000e+00> : vector<1x32xf32>
    %10 = tpu.matmul %9, %6, %cst_10 {dimension_numbers = #tpu.dot_dimension_numbers<[1], [0], [0], [1], [0, 0, 1, 1], [], []>} : vector<1x8xf32>, vector<8x32xf32>, vector<1x32xf32> -> vector<1x32xf32>
    %11 = vector.shape_cast %10 : vector<1x32xf32> to vector<1x1x32xf32>
    %12 = vector.broadcast %11 : vector<1x1x32xf32> to vector<8x8x32xf32>
    %13 = arith.subf %1, %12 : vector<8x8x32xf32>
    %14 = arith.mulf %13, %13 : vector<8x8x32xf32>
    %cst_11 = arith.constant dense<0.000000e+00> : vector<8x32xf32>
    %15 = vector.multi_reduction <add>, %14, %cst_11 [0] : vector<8x8x32xf32> to vector<8x32xf32>
    %cst_12 = arith.constant dense<0.000000e+00> : vector<32xf32>
    %16 = vector.multi_reduction <add>, %15, %cst_12 [0] : vector<8x32xf32> to vector<32xf32>
    %17 = vector.shape_cast %16 : vector<32xf32> to vector<1x32xf32>
    %cst_13 = arith.constant dense<0.000000e+00> : vector<1x8xf32>
    %18 = tpu.matmul %17, %5, %cst_13 {dimension_numbers = #tpu.dot_dimension_numbers<[1], [0], [0], [1], [0, 0, 1, 1], [], []>} : vector<1x32xf32>, vector<32x8xf32>, vector<1x8xf32> -> vector<1x8xf32>
    %cst_14 = arith.constant 3.906250e-03 : f32
    %19 = vector.broadcast %cst_14 : f32 to vector<1x8xf32>
    %20 = arith.mulf %18, %19 : vector<1x8xf32>
    %cst_15 = arith.constant 0.000000e+00 : f32
    %21 = vector.broadcast %cst_15 : f32 to vector<1x8xf32>
    %22 = arith.maximumf %20, %21 : vector<1x8xf32>
    %cst_16 = arith.constant 9.99999997E-7 : f32
    %23 = vector.broadcast %cst_16 : f32 to vector<1x8xf32>
    %24 = arith.addf %22, %23 : vector<1x8xf32>
    %25 = math.rsqrt %24 : vector<1x8xf32>
    %cst_17 = arith.constant dense<0.000000e+00> : vector<1x32xf32>
    %26 = tpu.matmul %25, %6, %cst_17 {dimension_numbers = #tpu.dot_dimension_numbers<[1], [0], [0], [1], [0, 0, 1, 1], [], []>} : vector<1x8xf32>, vector<8x32xf32>, vector<1x32xf32> -> vector<1x32xf32>
    %c0_18 = arith.constant 0 : index
    %c0_19 = arith.constant 0 : index
    %27 = vector.load %arg4[%c0_18, %c0_19] : memref<1x32xf32, #tpu.memory_space<vmem>>, vector<1x32xf32>
    %28 = arith.mulf %26, %27 : vector<1x32xf32>
    %c0_20 = arith.constant 0 : index
    %c0_21 = arith.constant 0 : index
    %29 = vector.load %arg5[%c0_20, %c0_21] : memref<1x32xf32, #tpu.memory_space<vmem>>, vector<1x32xf32>
    %30 = arith.mulf %10, %28 : vector<1x32xf32>
    %31 = arith.subf %29, %30 : vector<1x32xf32>
    %c0_22 = arith.constant 0 : index
    %c0_23 = arith.constant 0 : index
    %c0_24 = arith.constant 0 : index
    %32 = vector.load %arg6[%c0_22, %c0_23, %c0_24] : memref<1x1x32xf32, #tpu.memory_space<vmem>>, vector<1x1x32xf32>
    %33 = vector.shape_cast %32 : vector<1x1x32xf32> to vector<1x32xf32>
    %34 = vector.shape_cast %28 : vector<1x32xf32> to vector<1x1x32xf32>
    tpu.vector_store %arg6[%c0_22, %c0_23, %c0_24], %34 {strides = array<i32>} : memref<1x1x32xf32, #tpu.memory_space<vmem>>, vector<1x1x32xf32>,
    %c0_25 = arith.constant 0 : index
    %c0_26 = arith.constant 0 : index
    %c0_27 = arith.constant 0 : index
    %35 = vector.load %arg7[%c0_25, %c0_26, %c0_27] : memref<1x1x32xf32, #tpu.memory_space<vmem>>, vector<1x1x32xf32>
    %36 = vector.shape_cast %35 : vector<1x1x32xf32> to vector<1x32xf32>
    %37 = vector.shape_cast %31 : vector<1x32xf32> to vector<1x1x32xf32>
    tpu.vector_store %arg7[%c0_25, %c0_26, %c0_27], %37 {strides = array<i32>} : memref<1x1x32xf32, #tpu.memory_space<vmem>>, vector<1x1x32xf32>,
    return
  }
  func.func @transform_0(%arg0: i32) -> (i32, i32, i32, i32) {
    %c0_i32 = arith.constant 0 : i32
    %c0_i32_0 = arith.constant 0 : i32
    %c0_i32_1 = arith.constant 0 : i32
    %c0_i32_2 = arith.constant 0 : i32
    return %arg0, %c0_i32, %c0_i32_0, %c0_i32_1 : i32, i32, i32, i32
  }
  func.func @transform_1(%arg0: i32) -> (i32, i32) {
    %c0_i32 = arith.constant 0 : i32
    %c0_i32_0 = arith.constant 0 : i32
    %c0_i32_1 = arith.constant 0 : i32
    return %c0_i32, %c0_i32_0 : i32, i32
  }
  func.func @transform_2(%arg0: i32) -> (i32, i32) {
    %c0_i32 = arith.constant 0 : i32
    %c0_i32_0 = arith.constant 0 : i32
    %c0_i32_1 = arith.constant 0 : i32
    return %c0_i32, %c0_i32_0 : i32, i32
  }
  func.func @transform_3(%arg0: i32) -> (i32, i32) {
    %c0_i32 = arith.constant 0 : i32
    %c0_i32_0 = arith.constant 0 : i32
    %c0_i32_1 = arith.constant 0 : i32
    return %c0_i32, %c0_i32_0 : i32, i32
  }
  func.func @transform_4(%arg0: i32) -> (i32, i32) {
    %c0_i32 = arith.constant 0 : i32
    %c0_i32_0 = arith.constant 0 : i32
    %c0_i32_1 = arith.constant 0 : i32
    return %c0_i32, %c0_i32_0 : i32, i32
  }
  func.func @transform_5(%arg0: i32) -> (i32, i32, i32) {
    %c0_i32 = arith.constant 0 : i32
    %c0_i32_0 = arith.constant 0 : i32
    %c0_i32_1 = arith.constant 0 : i32
    return %arg0, %c0_i32, %c0_i32_0 : i32, i32, i32
  }
  func.func @transform_6(%arg0: i32) -> (i32, i32, i32) {
    %c0_i32 = arith.constant 0 : i32
    %c0_i32_0 = arith.constant 0 : i32
    %c0_i32_1 = arith.constant 0 : i32
    return %arg0, %c0_i32, %c0_i32_0 : i32, i32, i32
  }
}

</mosaic_0001>

<bundles_post_ra>
// kernel: tpu_custom_call.1
= control target key start
LH: loop header
LB: loop body
LE: loop exit
PB: predicated region body
PF: predicated region fallthrough
CT: control target
= control target key end

     0   :  { %12 = vsyncpa [#allocation3], 0  ;;  %s1044_s0 = inlined_call_operand.hbm [shape: f32[2,8,8,32], index: 0, kind: input, shape index: {}]   ;;  %s1045_s1 = inlined_call_operand.vmem [shape: f32[32,8], index: 1, kind: input, shape index: {}]   ;;  %s1046_s2 = inlined_call_operand.vmem [shape: f32[8,32], index: 2, kind: input, shape index: {}]   ;;  %s1047_s3 = inlined_call_operand.vmem [shape: f32[1,32], index: 3, kind: input, shape index: {}]   ;;  %s1048_s4 = inlined_call_operand.vmem [shape: f32[1,32], index: 4, kind: input, shape index: {}]   ;;  %s1049_s5 = inlined_call_operand.hbm [shape: f32[2,1,32], index: 5, kind: output, shape index: {0}]   ;;  %s1050_s6 = inlined_call_operand.hbm [shape: f32[2,1,32], index: 6, kind: output, shape index: {1}]  }
   0x1   :  { %14 = vsyncpa [#allocation3 + $0x1], 0 }
   0x2   :  { %15 = vsyncpa [#allocation4], 0 }
   0x3   :  { %17 = vsyncpa [#allocation4 + $0x1], 0 }
   0x4   :  { %18 = vsyncpa [#allocation7], 0 }
   0x5   :  { %20 = vsyncpa [#allocation7 + $0x1], 0  ;;  %s832_s21 = smov 0   ;;  %s834_s22 = smov 0  }
   0x6   :  { %s836_s23 = smov 0   ;;  %s838_s24 = smov 0  }
   0x7 LB: > { %s853_s25 = sadd.s32 4294967295, %s793_s24   ;;  %s595_s26 = sadd.s32 4294967294, %s793_s24   ;;  %s793_s24 = sphi %s838_s24, %s1060_s24   ;;  %s789_s23 = sphi %s836_s23, %s1059_s23   ;;  %s785_s22 = sphi %s834_s22, %s1058_s22   ;;  %s781_s21 = sphi %s832_s21, %s1057_s21  }
   0x8   : > { %s857_s27 = sadd.s32 1, %s793_s24   ;;  %s33_s28 = sadd.s32 1, %s789_s23 }
   0x9   : > { %s30_s29 = ssub.s32 %s793_s24, %s857_s27  ;;  %p40_p0 = scmp.ne.s32.totalorder %s789_s23, %s785_s22 }
   0xa   : > { %p31_p1 = scmp.eq.s32.totalorder %s30_s29, 0  ;;  %p41_p2 = scmp.eq.s32.totalorder %s793_s24, 0 }
   0xb   : > { %p46_p3 = scmp.ne.s32.totalorder %s785_s22, %s781_s21  ;;  %p47_p4 = scmp.eq.s32.totalorder %s853_s25, 0 }
   0xc   : > { %s869_s30 = scalar_select %p31_p1, %s789_s23, %s33_s28  }
   0xd   : > { %p871_p5 = por %p41_p2, %p40_p0  ;;  %p875_p6 = por %p47_p4, %p46_p3 }
   0xe   : > { %p154_p7 = scmp.eq.s32.totalorder %s853_s25, 1  ;;  %p160_p8 = scmp.eq.s32.totalorder %s595_s26, 1 }
   0xf   : > { %p627_p10 = scmp.lt.s32.totalorder %s793_s24, 2  ;;  %s218_s11 = sand.u32 1, %s789_s23  }
  0x10   : > { %p882_p11 = por %p154_p7, %p40_p0  ;;  %p886_p12 = por %p160_p8, %p46_p3 }
  0x11   : > { %s609_s12 = sshll.u32 %s793_s24, 6  ;;  %s598_s13 = sshll.u32 %s218_s11, 6 }
  0x12   : > { %s227_s16 = scalar_lea.hbm %s1044_s0, %s609_s12  ;;  %s222_s18 = scalar_lea.vmem [#allocation2], %s598_s13 }
  0x13   : > { %s228_s17 = sshll.u32 %s227_s16, 4  ;;  %s230_s19 = sshll.u32 %s222_s18, 4  ;;  %s229_s17 = int_to_ptr.hbm [resolvable:$true] %s228_s17  ;;  %s231_s19 = int_to_ptr.vmem [resolvable:$true] %s230_s19 }
  0x14   : > { %p897_p13 = pnand %p627_p10, %p871_p5  ;;  %p601_p0 = scmp.ge.s32.totalorder %s793_s24, 1 }
  0x15   : > { %p238_p1 = scmp.lt.s32.totalorder %s793_s24, 3  ;;  %s219_s26 = scalar_lea.sflag [#allocation3], %s218_s11 }
  0x16   : > { %s665_s28 = sshra.s32 %s229_s17, 4  ;;  %p669_p3 = pneg %p897_p13  ;;  %s666_s28 = int_to_ptr.hbm [resolvable:$true] %s665_s28 }
  0x17   : > { %s667_s29 = scalar_lea.hbm %s666_s28, 64  ;;  %s672_s7 = scalar_lea.hbm %s1044_s0, 128 }
  0x18   : > { %p668_p2 = scmp.ne.s32.totalorder %s666_s28, %s667_s29  ;;  %p673_p5 = scmp.lt.s32.totalorder %s666_s28, %s1044_s0 }
  0x19   : > { %p674_p8 = scmp.lt.s32.totalorder %s672_s7, %s667_s29 }
  0x1a   : > { %p670_p4 = pnand %p669_p3, %p668_p2 }
  0x1b   : > { %p675_p10 = por %p674_p8, %p673_p5 }
  0x1c   : > { %p671_p7 = pneg %p670_p4 }
  0x1e   : > { %p676_p9 = pnand %p675_p10, %p671_p7 }
  0x20   : > { %679 = shalt.err (!%p676_p9)
}
  0x21   : > { %s795_s11 = smov 128   ;;  %s796_s16 = smov 8  }
  0x22   : > { %619 = dma.hbm_to_vmem [thread:$0]  (!%p897_p13), %s229_s17, 1024, %s231_s19, %s219_s26, %s795_s11, %s795_s11, %s796_s16  }
  0x23   : > { %p239_p2 = pnand %p601_p0, %p238_p1 }
  0x24   : > { %s918_s18 = sand.u32 (!%p239_p2), 1, %s785_s22  }
  0x25   : > { %242 = sbr.rel (%p239_p2) target bundleno = 666 (0x29a), region = 40  ;;  %s602_s28 = sshll.u32 (!%p239_p2), %s918_s18, 6 }
  0x26   : > { %s245_s29 = scalar_lea.sflag (!%p239_p2), [#allocation3], %s918_s18  ;;  %s922_s12 = scalar_lea.vmem (!%p239_p2), [#allocation2], %s602_s28 }
  0x2a   : > { %768 = dma.done.wait (%p875_p6), %s245_s29, 1024  }
  0x2b   : > { %770 = vsyncadd (%p875_p6), %s245_s29, 4294966272  ;;  %vm289_vm0 = vcmask 261120   ;;  %v315_v0 = vld [vmem:[%s1045_s1 + $0x18] sm:$0xff]  ;;  %v314_v1 = vld [vmem:[%s1045_s1 + $0x10] sm:$0xff]  ;;  %vm341_vm1 = vcmask 64512   ;;  %s484_s29 = scalar_lea.hbm %s1049_s5, %s853_s25  ;;  %s274_s19 = scalar_lea.vmem [#allocation5], %s918_s18 }
  0x2c   : > { %332 = vmatpush.msra.mxu0 %v315_v0  ;;  %v281_v2 = vld [vmem:[%s922_s12] sm:$0xff]  ;;  %v282_v3 = vld [vmem:[%s922_s12 + $0x8] sm:$0xff]  ;;  %419 = vmatpush.msra.mxu2 %v315_v0  ;;  %v283_v5 = vld [vmem:[%s922_s12 + $0x10] sm:$0xff]  ;;  %s984_s20 = sshll.u32 %s274_s19, 4  ;;  %s488_s26 = sshll.u32 %s484_s29, 4  ;;  %vm468_vm5 = vcmask 253952   ;;  %s487_s20 = int_to_ptr.vmem [resolvable:$true] %s984_s20  ;;  %s489_s26 = int_to_ptr.hbm [resolvable:$true] %s488_s26 }
  0x2d   : > { %v313_v4 = vld [vmem:[%s1045_s1 + $0x8] sm:$0xff]  ;;  %v284_v6 = vld [vmem:[%s922_s12 + $0x18] sm:$0xff]  ;;  %v290_v7 = vsel %vm289_vm0, %v281_v2, 0.0  ;;  %v291_v8 = vsel %vm289_vm0, %v282_v3, 0.0  ;;  %v285_v9 = vld [vmem:[%s922_s12 + $0x20] sm:$0xff]  ;;  %v293_v11 = vsel %vm289_vm0, %v283_v5, 0.0  ;;  %s497_s7 = scalar_lea.hbm %s1050_s6, %s853_s25 }
  0x2e   : > { %333 = vmatpush.msra.mxu0 %v314_v1  ;;  %v292_v10 = vadd.f32 %v291_v8, %v290_v7  ;;  %420 = vmatpush.msra.mxu2 %v314_v1  ;;  %v312_v12 = vld [vmem:[%s1045_s1] sm:$0xff]  ;;  %v295_v13 = vsel %vm289_vm0, %v284_v6, 0.0  ;;  %v286_v14 = vld [vmem:[%s922_s12 + $0x28] sm:$0xff]  ;;  %v297_v16 = vsel %vm289_vm0, %v285_v9, 0.0  ;;  %v287_v17 = vld [vmem:[%s922_s12 + $0x30] sm:$0xff]  ;;  %s280_s11 = scalar_lea.vmem [#allocation6], %s918_s18 }
  0x2f   : > { %v299_v19 = vsel %vm289_vm0, %v286_v14, 0.0  ;;  %v288_v20 = vld [vmem:[%s922_s12 + $0x38] sm:$0xff]  ;;  %v301_v22 = vsel %vm289_vm0, %v287_v17, 0.0  ;;  %v316_v34 = vld [vmem:[%s1046_s2] sm:$0xff]  ;;  %s995_s16 = sshll.u32 %s280_s11, 4  ;;  %s997_s28 = sshll.u32 %s497_s7, 4  ;;  %s500_s16 = int_to_ptr.vmem [resolvable:$true] %s995_s16  ;;  %s502_s28 = int_to_ptr.hbm [resolvable:$true] %s997_s28 }
  0x30   : > { %334 = vmatpush.msra.mxu0 %v313_v4  ;;  %v294_v15 = vadd.f32 %v293_v11, %v292_v10  ;;  %421 = vmatpush.msra.mxu2 %v313_v4  ;;  %v303_v24 = vsel %vm289_vm0, %v288_v20, 0.0  ;;  %s472_s25 = scalar_lea.sflag [#allocation4], %s918_s18  ;;  %s709_s29 = sshra.s32 %s489_s26, 4  ;;  %s710_s29 = int_to_ptr.hbm [resolvable:$true] %s709_s29 }
  0x31   : > { %360 = vmatpush.msra.mxu1 %v316_v34  ;;  %458 = vmatpush.msra.mxu3 %v316_v34  ;;  %s711_s12 = scalar_lea.hbm %s710_s29, 1  ;;  %s715_s13 = scalar_lea.hbm %s1049_s5, 2 }
  0x32   : > { %335 = vmatpush.msra.mxu0 %v312_v12  ;;  %v296_v18 = vadd.f32 %v295_v13, %v294_v15  ;;  %422 = vmatpush.msra.mxu2 %v312_v12  ;;  %p712_p6 = scmp.ne.s32.totalorder %s710_s29, %s711_s12  ;;  %p716_p0 = scmp.lt.s32.totalorder %s710_s29, %s1049_s5 }
  0x33   : > { %p717_p1 = scmp.lt.s32.totalorder %s715_s13, %s711_s12 }
  0x34   : > { %v298_v21 = vadd.f32 %v297_v16, %v296_v18  ;;  %p713_p9 = pnand %p712_p6, %p882_p11 }
  0x35   : > { %p718_p3 = por %p717_p1, %p716_p0 }
  0x36   : > { %v300_v23 = vadd.f32 %v299_v19, %v298_v21  ;;  %p714_p13 = pneg %p713_p9 }
  0x38   : > { %v302_v25 = vadd.f32 %v301_v22, %v300_v23  ;;  %p719_p4 = pnand %p718_p3, %p714_p13 }
  0x3a   : > { %v304_v26 = vadd.f32 %v303_v24, %v302_v25  ;;  %v463_v24 = vld [vmem:[%s1047_s3] sm:$0x1] }
  0x3c   : > { %v305_v27 = vsel %vm289_vm0, %v304_v26, 0.0 }
  0x3d   : > { %v306_v28 = vrot.slane %v305_v27, 4 }
  0x3f   : > { %v307_v29 = vadd.f32 %v306_v28, %v305_v27  ;;  %v465_v27 = vld [vmem:[%s1048_s4] sm:$0x1] }
  0x41   : > { %v308_v30 = vrot.slane %v307_v29, 2 }
  0x43   : > { %v309_v31 = vadd.f32 %v308_v30, %v307_v29 }
  0x45   : > { %v310_v32 = vrot.slane %v309_v31, 1 }
  0x47   : > { %v311_v33 = vadd.f32 %v310_v32, %v309_v31 }
  0x49   : > { %603 = vmatmul.msk.f32.vlgmr.msra.gmra.mxu0 %vm289_vm0, %v311_v33 }
  0xc6   : > { %v337_v35 = vpop.f32.mrf.mxu0 }
  0xc7   : > { %v340_v36 = vmul.f32 0.00390625, %v337_v35 }
  0xc9   : > { %604 = vmatmul.msk.f32.vlgmr.msra.gmra.mxu1 %vm341_vm1, %v340_v36 }
 0x146   : > { %v962_v37 = vpop.f32.mrf.mxu1 }
 0x147   : > { %v365_v38 = vperm.slane %v962_v37, 0 }
 0x149   : > { %v366_v39 = vsub.f32 %v281_v2, %v365_v38  ;;  %v367_v40 = vsub.f32 %v282_v3, %v365_v38  ;;  %v368_v41 = vsub.f32 %v283_v5, %v365_v38  ;;  %v369_v42 = vsub.f32 %v284_v6, %v365_v38 }
 0x14a   : > { %v370_v43 = vsub.f32 %v285_v9, %v365_v38  ;;  %v371_v47 = vsub.f32 %v286_v14, %v365_v38  ;;  %v372_v52 = vsub.f32 %v287_v17, %v365_v38  ;;  %v373_v56 = vsub.f32 %v288_v20, %v365_v38 }
 0x14b   : > { %v374_v44 = vmul.f32 %v366_v39, %v366_v39  ;;  %v375_v45 = vmul.f32 %v367_v40, %v367_v40  ;;  %v376_v46 = vmul.f32 %v368_v41, %v368_v41  ;;  %v377_v48 = vmul.f32 %v369_v42, %v369_v42 }
 0x14c   : > { %v378_v53 = vmul.f32 %v370_v43, %v370_v43  ;;  %v379_v57 = vmul.f32 %v371_v47, %v371_v47  ;;  %v380_v60 = vmul.f32 %v372_v52, %v372_v52  ;;  %v381_v63 = vmul.f32 %v373_v56, %v373_v56 }
 0x14d   : > { %v382_v49 = vsel %vm289_vm0, %v374_v44, 0.0  ;;  %v383_v50 = vsel %vm289_vm0, %v375_v45, 0.0  ;;  %v385_v54 = vsel %vm289_vm0, %v376_v46, 0.0  ;;  %v387_v58 = vsel %vm289_vm0, %v377_v48, 0.0 }
 0x14e   : > { %v384_v51 = vadd.f32 %v383_v50, %v382_v49  ;;  %v389_v61 = vsel %vm289_vm0, %v378_v53, 0.0  ;;  %v391_v0 = vsel %vm289_vm0, %v379_v57, 0.0  ;;  %v393_v2 = vsel %vm289_vm0, %v380_v60, 0.0 }
 0x14f   : > { %v395_v4 = vsel %vm289_vm0, %v381_v63, 0.0 }
 0x150   : > { %v386_v55 = vadd.f32 %v385_v54, %v384_v51 }
 0x152   : > { %v388_v59 = vadd.f32 %v387_v58, %v386_v55 }
 0x154   : > { %v390_v62 = vadd.f32 %v389_v61, %v388_v59 }
 0x156   : > { %v392_v1 = vadd.f32 %v391_v0, %v390_v62 }
 0x158   : > { %v394_v3 = vadd.f32 %v393_v2, %v392_v1 }
 0x15a   : > { %v396_v5 = vadd.f32 %v395_v4, %v394_v3 }
 0x15c   : > { %v397_v6 = vsel %vm289_vm0, %v396_v5, 0.0 }
 0x15d   : > { %v398_v7 = vrot.slane %v397_v6, 4 }
 0x15f   : > { %v399_v8 = vadd.f32 %v398_v7, %v397_v6 }
 0x161   : > { %v400_v9 = vrot.slane %v399_v8, 2 }
 0x163   : > { %v401_v10 = vadd.f32 %v400_v9, %v399_v8 }
 0x165   : > { %v402_v11 = vrot.slane %v401_v10, 1 }
 0x167   : > { %v403_v12 = vadd.f32 %v402_v11, %v401_v10 }
 0x169   : > { %605 = vmatmul.msk.f32.vlgmr.msra.gmra.mxu2 %vm289_vm0, %v403_v12 }
 0x1ec   : > { %v424_v13 = vpop.f32.mrf.mxu2 }
 0x1ed   : > { %v427_v14 = vmul.f32 0.00390625, %v424_v13 }
 0x1ef   : > { %v428_v15 = vmax.f32 %v427_v14, 0.0 }
 0x1f1   : > { %v429_v16 = vadd.f32 1e-06, %v428_v15 }
 0x1f3   : > { %663 = vrsqrt.f32 %v429_v16  ;;  %vm436_vm3 = vweird.f32 %v429_v16 }
 0x1f9   : > { %v664_v17 = vpop.eup %663 }
 0x1fa   : > { %v431_v18 = vmul.f32 %v664_v17, %v429_v16  ;;  %vm437_vm2 = vweird.f32 %v664_v17 }
 0x1fb   : > { %vm438_vm4 = vmor %vm436_vm3, %vm437_vm2 }
 0x1fc   : > { %v432_v19 = vmul.f32 %v664_v17, %v431_v18 }
 0x1fe   : > { %v433_v20 = vmul.f32 0.5, %v432_v19 }
 0x200   : > { %v434_v21 = vsub.f32 1.5, %v433_v20 }
 0x202   : > { %v435_v22 = vmul.f32 %v664_v17, %v434_v21 }
 0x204   : > { %v439_v23 = vsel %vm438_vm4, %v664_v17, %v435_v22 }
 0x205   : > { %606 = vmatmul.msk.f32.vlgmr.msra.gmra.mxu3 %vm341_vm1, %v439_v23 }
 0x288   : > { %v460_v25 = vpop.f32.mrf.mxu3 }
 0x289   : > { %v464_v26 = vmul.f32 %v463_v24, %v460_v25 }
 0x28b   : > { %v466_v28 = vmul.f32 %v464_v26, %v962_v37  ;;  %469 = vst.msk [vmem:[%s274_s19] sm:$0x1] %vm468_vm5, %v464_v26 }
 0x28c   : > { %722 = shalt.err (!%p719_p4)
}
 0x28d   : > { %612 = dma.vmem_to_hbm [thread:$0]  (%p882_p11), %s487_s20, 16, %s489_s26, %s472_s25   ;;  %v467_v29 = vsub.f32 %v465_v27, %v466_v28 }
 0x28e   : > { %s476_s19 = scalar_lea.sflag [#allocation7], %s918_s18  ;;  %s737_s7 = sshra.s32 %s502_s28, 4  ;;  %s738_s7 = int_to_ptr.hbm [resolvable:$true] %s737_s7 }
 0x28f   : > { %470 = vst.msk [vmem:[%s280_s11] sm:$0x1] %vm468_vm5, %v467_v29  ;;  %s739_s29 = scalar_lea.hbm %s738_s7, 1  ;;  %s743_s8 = scalar_lea.hbm %s1050_s6, 2 }
 0x290   : > { %p740_p7 = scmp.ne.s32.totalorder %s738_s7, %s739_s29  ;;  %p744_p10 = scmp.lt.s32.totalorder %s738_s7, %s1050_s6 }
 0x291   : > { %p745_p2 = scmp.lt.s32.totalorder %s743_s8, %s739_s29 }
 0x292   : > { %p741_p5 = pnand %p740_p7, %p882_p11 }
 0x293   : > { %p746_p6 = por %p745_p2, %p744_p10 }
 0x294   : > { %p742_p8 = pneg %p741_p5 }
 0x296   : > { %p747_p9 = pnand %p746_p6, %p742_p8 }
 0x298   : > { %750 = shalt.err (!%p747_p9)
}
 0x299   : > { %613 = dma.vmem_to_hbm [thread:$0]  (%p882_p11), %s500_s16, 16, %s502_s28, %s476_s19  }
 0x29a PF: > { %s513_s18 = sand.u32 1, %s781_s21   ;;  %p1056_p13 = scmp.ge.s32.totalorder %s793_s24, 2 }
 0x29b   : > { %s514_s20 = scalar_lea.sflag [#allocation4], %s513_s18 }
 0x29c   : > { %p621_p0 = pnand %p1056_p13, %p886_p12 }
 0x29e   : > { %p622_p1 = pneg %p621_p0 }
 0x2a0   : > { %772 = dma.done.wait (%p622_p1), %s514_s20, 16  }
 0x2a1   : > { %774 = vsyncadd (%p622_p1), %s514_s20, 4294967280  ;;  %s523_s26 = scalar_lea.sflag [#allocation7], %s513_s18 }
 0x2a2   : > { %776 = dma.done.wait (%p622_p1), %s523_s26, 16  }
 0x2a3   : > { %778 = vsyncadd (%p622_p1), %s523_s26, 4294967280  ;;  %p23_p11 = scmp.ge.s32.totalorder %s857_s27, 4   ;;  %s1057_s21 = smov %s785_s22 }
 0x2a4   : > { %s1058_s22 = smov %s789_s23  ;;  %s1059_s23 = smov %s869_s30 }
 0x2a5   : > { %s1060_s24 = smov %s857_s27  ;;  %25 = sbr.rel (!%p23_p11) target bundleno = 7 (0x7), region = 102 }
 0x2aa   :  { %528 = vsyncpa [#allocation3], 1 }
 0x2ab   :  { %530 = vsyncpa [#allocation3 + $0x1], 1 }
 0x2ac   :  { %531 = vsyncpa [#allocation4], 1 }
 0x2ad   :  { %533 = vsyncpa [#allocation4 + $0x1], 1 }
 0x2ae   :  { %534 = vsyncpa [#allocation7], 1 }
 0x2af   :  { %536 = vsyncpa [#allocation7 + $0x1], 1 }

</bundles_post_ra>
